<compile_context>
chip_gen: v7x
topology: tpu7x:2x2x1
jax: 0.10.0
libtpu: 0.0.40
codegen_flags: <defaults>
</compile_context>

<pallas_src>
import functools

import jax
import jax.numpy as jnp
from jax import lax
from jax.experimental import pallas as pl
from jax.experimental.pallas import tpu as pltpu


def _center_loss_kernel(
    labels_ref,    # SMEM (B_pad,) int32  -- scalar-prefetched labels
    x_ref,         # VMEM (TB, D)         -- batch tile of features
    centers_hbm,   # ANY/HBM (C, D)       -- full centers, row-gathered by DMA
    out_ref,       # SMEM (1, 1) float32  -- scalar loss output
    gather_buf,    # VMEM (TB, D)         -- gathered centers c_{label_i}
    sem,           # DMA semaphores (TB,)
    acc_ref,       # SMEM (1,) float32    -- running sum across grid steps
    *,
    batch,
    num_classes,
    tb,
):
    i = pl.program_id(0)
    base = i * tb

    @pl.when(i == 0)
    def _init():
        acc_ref[0] = jnp.float32(0.0)

    # ---- manual DMA gather: centers[labels[base + r]] -> gather_buf[r] ----
    # (start all TB row copies, then wait; TB is small and static)
    for r in range(tb):
        lab = labels_ref[base + r]
        pltpu.make_async_copy(
            centers_hbm.at[pl.ds(lab, 1), :],
            gather_buf.at[pl.ds(r, 1), :],
            sem.at[r],
        ).start()
    for r in range(tb):
        pltpu.make_async_copy(
            centers_hbm.at[pl.ds(0, 1), :],
            gather_buf.at[pl.ds(r, 1), :],
            sem.at[r],
        ).wait()

    # ---- per-row squared distance to own center (elementwise math in f32,
    #      same expansion as the PyTorch addmm_ formulation) ---------------
    x = x_ref[...].astype(jnp.float32)            # (TB, D)
    c = gather_buf[...].astype(jnp.float32)       # (TB, D)
    x_sq = jnp.sum(x * x, axis=1, keepdims=True)  # (TB, 1)
    c_sq = jnp.sum(c * c, axis=1, keepdims=True)  # (TB, 1)
    xc = jnp.sum(x * c, axis=1, keepdims=True)    # (TB, 1)
    d = jnp.clip(x_sq + c_sq - 2.0 * xc, 1e-12, 1e12)

    # mask rows beyond the true batch (batch padded up to a TB multiple)
    rows = base + lax.broadcasted_iota(jnp.int32, (tb, 1), 0)
    tile_sum = jnp.sum(jnp.where(rows < batch, d, 0.0))

    acc_ref[0] += tile_sum

    # Every non-matching (i, j) entry of the masked (B, C) distmat is
    # clamp(0, 1e-12, 1e12) == 1e-12 -> add analytically, divide by B.
    const = jnp.float32(batch * (num_classes - 1) * 1e-12)
    out_ref[0, 0] = (acc_ref[0] + const) / jnp.float32(batch)


def center_loss(labels, x, centers, *, tb=8):
    """labels: (B,) int, x: (B, D) float, centers: (C, D) float -> scalar f32.

    TODO(synk): the batch grid axis carries the scalar accumulator
    ("arbitrary"); a v7x 2-TC split would need per-core partial sums.
    """
    B, D = x.shape
    C = centers.shape[0]

    b_pad = ((B + tb - 1) // tb) * tb
    if b_pad != B:
        x = jnp.pad(x, ((0, b_pad - B), (0, 0)))
        labels = jnp.pad(labels, (0, b_pad - B))
    labels = labels.astype(jnp.int32)

    kernel = functools.partial(
        _center_loss_kernel, batch=B, num_classes=C, tb=tb
    )

    out = pl.pallas_call(
        kernel,
        out_shape=jax.ShapeDtypeStruct((1, 1), jnp.float32),
        grid_spec=pltpu.PrefetchScalarGridSpec(
            num_scalar_prefetch=1,                      # labels -> SMEM
            grid=(b_pad // tb,),
            in_specs=[
                pl.BlockSpec((tb, D), lambda i, lab: (i, 0)),  # x tile (VMEM)
                pl.BlockSpec(memory_space=pl.ANY),             # centers (HBM)
            ],
            out_specs=pl.BlockSpec(
                (1, 1), lambda i, lab: (0, 0),
                memory_space=pltpu.MemorySpace.SMEM,
            ),
            scratch_shapes=[
                pltpu.VMEM((tb, D), centers.dtype),   # gathered centers
                pltpu.SemaphoreType.DMA((tb,)),       # per-row DMA sems
                pltpu.SMEM((1,), jnp.float32),        # scalar accumulator
            ],
        ),
        compiler_params=pltpu.CompilerParams(
            dimension_semantics=("arbitrary",),
        ),
    )(labels, x, centers)
    return out[0, 0]


def center_loss_ref(labels, x, centers):
    """Pure-JAX reference mirroring the PyTorch forward exactly."""
    B = x.shape[0]
    C = centers.shape[0]
    distmat = (
        jnp.sum(x**2, axis=1, keepdims=True)
        + jnp.sum(centers**2, axis=1, keepdims=True).T
        - 2.0 * x @ centers.T
    )
    mask = (labels[:, None] == jnp.arange(C)[None, :]).astype(jnp.float32)
    d = jnp.clip(distmat * mask, 1e-12, 1e12)
    return jnp.sum(d) / B


if __name__ == "__main__":
    key = jax.random.PRNGKey(0)
    k_x, k_c, k_l = jax.random.split(key, 3)

    batch = 16
    num_classes = 8
    feat_dim = 256

    x = jax.random.normal(k_x, (batch, feat_dim), dtype=jnp.float32)
    centers = jax.random.normal(k_c, (num_classes, feat_dim), dtype=jnp.float32)
    labels = jax.random.randint(k_l, (batch,), 0, num_classes, dtype=jnp.int32)

    loss = center_loss(labels, x, centers)
    jax.block_until_ready(loss)

    ref = center_loss_ref(labels, x, centers)
    assert jnp.allclose(loss, ref, rtol=1e-4, atol=1e-4), (loss, ref)

    print("KERNEL_OK")
</pallas_src>

<mosaic_0001>
module attributes {stable_mosaic.version = 11 : i64} {
  func.func @_center_loss_kernel(%arg0: i32, %arg1: memref<16xi32, #tpu.memory_space<smem>>, %arg2: memref<8x256xf32, #tpu.memory_space<vmem>>, %arg3: memref<8x256xf32, #tpu.memory_space<any>>, %arg4: memref<1x1xf32, #tpu.memory_space<smem>>, %arg5: memref<8x256xf32, #tpu.memory_space<vmem>>, %arg6: memref<8x!tpu.dma_semaphore, #tpu.memory_space<semaphore_mem>>, %arg7: memref<1xf32, #tpu.memory_space<smem>>) attributes {dimension_semantics = [#tpu.dimension_semantics<arbitrary>], iteration_bounds = array<i64: 2>, scalar_prefetch = 1 : i64, scratch_operands = 3 : i64, tpu.core_type = #tpu.core_type<tc>, window_params = [{transform_indices = @transform_0, window_bounds = array<i64: 8, 256>}, {}, {transform_indices = @transform_2, window_bounds = array<i64: 1, 1>}]} {
    %c8_i32 = arith.constant 8 : i32
    %0 = arith.muli %arg0, %c8_i32 : i32
    %c0_i32 = arith.constant 0 : i32
    %1 = arith.cmpi eq, %arg0, %c0_i32 : i32
    %2 = arith.extui %1 : i1 to i32
    %c0_i32_0 = arith.constant 0 : i32
    %3 = arith.cmpi ne, %2, %c0_i32_0 : i32
    scf.if %3 {
      %cst_91 = arith.constant 0.000000e+00 : f32
      %c0_92 = arith.constant 0 : index
      %129 = memref.load %arg7[%c0_92] : memref<1xf32, #tpu.memory_space<smem>>
      memref.store %cst_91, %arg7[%c0_92] : memref<1xf32, #tpu.memory_space<smem>>
    } else {
    }
    %c0_i32_1 = arith.constant 0 : i32
    %4 = arith.addi %0, %c0_i32_1 : i32
    %5 = arith.index_cast %4 : i32 to index
    %6 = memref.load %arg1[%5] : memref<16xi32, #tpu.memory_space<smem>>
    %c0_i32_2 = arith.constant 0 : i32
    %c0_i32_3 = arith.constant 0 : i32
    %7 = tpu.memref_slice %arg3[%6, %c0_i32_3] : memref<8x256xf32, #tpu.memory_space<any>> -> memref<1x256xf32, #tpu.memory_space<any>>
    %c0_i32_4 = arith.constant 0 : i32
    %c0_i32_5 = arith.constant 0 : i32
    %8 = tpu.memref_slice %arg5[%c0_i32_4, %c0_i32_5] : memref<8x256xf32, #tpu.memory_space<vmem>> -> memref<1x256xf32, #tpu.memory_space<vmem>>
    %9 = tpu.memref_slice %arg6[%c0_i32_2] : memref<8x!tpu.dma_semaphore, #tpu.memory_space<semaphore_mem>> -> memref<1x!tpu.dma_semaphore, #tpu.memory_space<semaphore_mem>>
    %10 = tpu.memref_squeeze %9 : memref<1x!tpu.dma_semaphore, #tpu.memory_space<semaphore_mem>> -> memref<!tpu.dma_semaphore, #tpu.memory_space<semaphore_mem>>
    tpu.enqueue_dma source(%7 : memref<1x256xf32, #tpu.memory_space<any>>) target(%8 : memref<1x256xf32, #tpu.memory_space<vmem>>) target_semaphore(%10 : memref<!tpu.dma_semaphore, #tpu.memory_space<semaphore_mem>>)
    %c1_i32 = arith.constant 1 : i32
    %11 = arith.addi %0, %c1_i32 : i32
    %12 = arith.index_cast %11 : i32 to index
    %13 = memref.load %arg1[%12] : memref<16xi32, #tpu.memory_space<smem>>
    %c1_i32_6 = arith.constant 1 : i32
    %c0_i32_7 = arith.constant 0 : i32
    %14 = tpu.memref_slice %arg3[%13, %c0_i32_7] : memref<8x256xf32, #tpu.memory_space<any>> -> memref<1x256xf32, #tpu.memory_space<any>>
    %c1_i32_8 = arith.constant 1 : i32
    %c0_i32_9 = arith.constant 0 : i32
    %15 = tpu.memref_slice %arg5[%c1_i32_8, %c0_i32_9] : memref<8x256xf32, #tpu.memory_space<vmem>> -> memref<1x256xf32, #tpu.memory_space<vmem>>
    %16 = tpu.memref_slice %arg6[%c1_i32_6] : memref<8x!tpu.dma_semaphore, #tpu.memory_space<semaphore_mem>> -> memref<1x!tpu.dma_semaphore, #tpu.memory_space<semaphore_mem>>
    %17 = tpu.memref_squeeze %16 : memref<1x!tpu.dma_semaphore, #tpu.memory_space<semaphore_mem>> -> memref<!tpu.dma_semaphore, #tpu.memory_space<semaphore_mem>>
    tpu.enqueue_dma source(%14 : memref<1x256xf32, #tpu.memory_space<any>>) target(%15 : memref<1x256xf32, #tpu.memory_space<vmem>>) target_semaphore(%17 : memref<!tpu.dma_semaphore, #tpu.memory_space<semaphore_mem>>)
    %c2_i32 = arith.constant 2 : i32
    %18 = arith.addi %0, %c2_i32 : i32
    %19 = arith.index_cast %18 : i32 to index
    %20 = memref.load %arg1[%19] : memref<16xi32, #tpu.memory_space<smem>>
    %c2_i32_10 = arith.constant 2 : i32
    %c0_i32_11 = arith.constant 0 : i32
    %21 = tpu.memref_slice %arg3[%20, %c0_i32_11] : memref<8x256xf32, #tpu.memory_space<any>> -> memref<1x256xf32, #tpu.memory_space<any>>
    %c2_i32_12 = arith.constant 2 : i32
    %c0_i32_13 = arith.constant 0 : i32
    %22 = tpu.memref_slice %arg5[%c2_i32_12, %c0_i32_13] : memref<8x256xf32, #tpu.memory_space<vmem>> -> memref<1x256xf32, #tpu.memory_space<vmem>>
    %23 = tpu.memref_slice %arg6[%c2_i32_10] : memref<8x!tpu.dma_semaphore, #tpu.memory_space<semaphore_mem>> -> memref<1x!tpu.dma_semaphore, #tpu.memory_space<semaphore_mem>>
    %24 = tpu.memref_squeeze %23 : memref<1x!tpu.dma_semaphore, #tpu.memory_space<semaphore_mem>> -> memref<!tpu.dma_semaphore, #tpu.memory_space<semaphore_mem>>
    tpu.enqueue_dma source(%21 : memref<1x256xf32, #tpu.memory_space<any>>) target(%22 : memref<1x256xf32, #tpu.memory_space<vmem>>) target_semaphore(%24 : memref<!tpu.dma_semaphore, #tpu.memory_space<semaphore_mem>>)
    %c3_i32 = arith.constant 3 : i32
    %25 = arith.addi %0, %c3_i32 : i32
    %26 = arith.index_cast %25 : i32 to index
    %27 = memref.load %arg1[%26] : memref<16xi32, #tpu.memory_space<smem>>
    %c3_i32_14 = arith.constant 3 : i32
    %c0_i32_15 = arith.constant 0 : i32
    %28 = tpu.memref_slice %arg3[%27, %c0_i32_15] : memref<8x256xf32, #tpu.memory_space<any>> -> memref<1x256xf32, #tpu.memory_space<any>>
    %c3_i32_16 = arith.constant 3 : i32
    %c0_i32_17 = arith.constant 0 : i32
    %29 = tpu.memref_slice %arg5[%c3_i32_16, %c0_i32_17] : memref<8x256xf32, #tpu.memory_space<vmem>> -> memref<1x256xf32, #tpu.memory_space<vmem>>
    %30 = tpu.memref_slice %arg6[%c3_i32_14] : memref<8x!tpu.dma_semaphore, #tpu.memory_space<semaphore_mem>> -> memref<1x!tpu.dma_semaphore, #tpu.memory_space<semaphore_mem>>
    %31 = tpu.memref_squeeze %30 : memref<1x!tpu.dma_semaphore, #tpu.memory_space<semaphore_mem>> -> memref<!tpu.dma_semaphore, #tpu.memory_space<semaphore_mem>>
    tpu.enqueue_dma source(%28 : memref<1x256xf32, #tpu.memory_space<any>>) target(%29 : memref<1x256xf32, #tpu.memory_space<vmem>>) target_semaphore(%31 : memref<!tpu.dma_semaphore, #tpu.memory_space<semaphore_mem>>)
    %c4_i32 = arith.constant 4 : i32
    %32 = arith.addi %0, %c4_i32 : i32
    %33 = arith.index_cast %32 : i32 to index
    %34 = memref.load %arg1[%33] : memref<16xi32, #tpu.memory_space<smem>>
    %c4_i32_18 = arith.constant 4 : i32
    %c0_i32_19 = arith.constant 0 : i32
    %35 = tpu.memref_slice %arg3[%34, %c0_i32_19] : memref<8x256xf32, #tpu.memory_space<any>> -> memref<1x256xf32, #tpu.memory_space<any>>
    %c4_i32_20 = arith.constant 4 : i32
    %c0_i32_21 = arith.constant 0 : i32
    %36 = tpu.memref_slice %arg5[%c4_i32_20, %c0_i32_21] : memref<8x256xf32, #tpu.memory_space<vmem>> -> memref<1x256xf32, #tpu.memory_space<vmem>>
    %37 = tpu.memref_slice %arg6[%c4_i32_18] : memref<8x!tpu.dma_semaphore, #tpu.memory_space<semaphore_mem>> -> memref<1x!tpu.dma_semaphore, #tpu.memory_space<semaphore_mem>>
    %38 = tpu.memref_squeeze %37 : memref<1x!tpu.dma_semaphore, #tpu.memory_space<semaphore_mem>> -> memref<!tpu.dma_semaphore, #tpu.memory_space<semaphore_mem>>
    tpu.enqueue_dma source(%35 : memref<1x256xf32, #tpu.memory_space<any>>) target(%36 : memref<1x256xf32, #tpu.memory_space<vmem>>) target_semaphore(%38 : memref<!tpu.dma_semaphore, #tpu.memory_space<semaphore_mem>>)
    %c5_i32 = arith.constant 5 : i32
    %39 = arith.addi %0, %c5_i32 : i32
    %40 = arith.index_cast %39 : i32 to index
    %41 = memref.load %arg1[%40] : memref<16xi32, #tpu.memory_space<smem>>
    %c5_i32_22 = arith.constant 5 : i32
    %c0_i32_23 = arith.constant 0 : i32
    %42 = tpu.memref_slice %arg3[%41, %c0_i32_23] : memref<8x256xf32, #tpu.memory_space<any>> -> memref<1x256xf32, #tpu.memory_space<any>>
    %c5_i32_24 = arith.constant 5 : i32
    %c0_i32_25 = arith.constant 0 : i32
    %43 = tpu.memref_slice %arg5[%c5_i32_24, %c0_i32_25] : memref<8x256xf32, #tpu.memory_space<vmem>> -> memref<1x256xf32, #tpu.memory_space<vmem>>
    %44 = tpu.memref_slice %arg6[%c5_i32_22] : memref<8x!tpu.dma_semaphore, #tpu.memory_space<semaphore_mem>> -> memref<1x!tpu.dma_semaphore, #tpu.memory_space<semaphore_mem>>
    %45 = tpu.memref_squeeze %44 : memref<1x!tpu.dma_semaphore, #tpu.memory_space<semaphore_mem>> -> memref<!tpu.dma_semaphore, #tpu.memory_space<semaphore_mem>>
    tpu.enqueue_dma source(%42 : memref<1x256xf32, #tpu.memory_space<any>>) target(%43 : memref<1x256xf32, #tpu.memory_space<vmem>>) target_semaphore(%45 : memref<!tpu.dma_semaphore, #tpu.memory_space<semaphore_mem>>)
    %c6_i32 = arith.constant 6 : i32
    %46 = arith.addi %0, %c6_i32 : i32
    %47 = arith.index_cast %46 : i32 to index
    %48 = memref.load %arg1[%47] : memref<16xi32, #tpu.memory_space<smem>>
    %c6_i32_26 = arith.constant 6 : i32
    %c0_i32_27 = arith.constant 0 : i32
    %49 = tpu.memref_slice %arg3[%48, %c0_i32_27] : memref<8x256xf32, #tpu.memory_space<any>> -> memref<1x256xf32, #tpu.memory_space<any>>
    %c6_i32_28 = arith.constant 6 : i32
    %c0_i32_29 = arith.constant 0 : i32
    %50 = tpu.memref_slice %arg5[%c6_i32_28, %c0_i32_29] : memref<8x256xf32, #tpu.memory_space<vmem>> -> memref<1x256xf32, #tpu.memory_space<vmem>>
    %51 = tpu.memref_slice %arg6[%c6_i32_26] : memref<8x!tpu.dma_semaphore, #tpu.memory_space<semaphore_mem>> -> memref<1x!tpu.dma_semaphore, #tpu.memory_space<semaphore_mem>>
    %52 = tpu.memref_squeeze %51 : memref<1x!tpu.dma_semaphore, #tpu.memory_space<semaphore_mem>> -> memref<!tpu.dma_semaphore, #tpu.memory_space<semaphore_mem>>
    tpu.enqueue_dma source(%49 : memref<1x256xf32, #tpu.memory_space<any>>) target(%50 : memref<1x256xf32, #tpu.memory_space<vmem>>) target_semaphore(%52 : memref<!tpu.dma_semaphore, #tpu.memory_space<semaphore_mem>>)
    %c7_i32 = arith.constant 7 : i32
    %53 = arith.addi %0, %c7_i32 : i32
    %54 = arith.index_cast %53 : i32 to index
    %55 = memref.load %arg1[%54] : memref<16xi32, #tpu.memory_space<smem>>
    %c7_i32_30 = arith.constant 7 : i32
    %c0_i32_31 = arith.constant 0 : i32
    %56 = tpu.memref_slice %arg3[%55, %c0_i32_31] : memref<8x256xf32, #tpu.memory_space<any>> -> memref<1x256xf32, #tpu.memory_space<any>>
    %c7_i32_32 = arith.constant 7 : i32
    %c0_i32_33 = arith.constant 0 : i32
    %57 = tpu.memref_slice %arg5[%c7_i32_32, %c0_i32_33] : memref<8x256xf32, #tpu.memory_space<vmem>> -> memref<1x256xf32, #tpu.memory_space<vmem>>
    %58 = tpu.memref_slice %arg6[%c7_i32_30] : memref<8x!tpu.dma_semaphore, #tpu.memory_space<semaphore_mem>> -> memref<1x!tpu.dma_semaphore, #tpu.memory_space<semaphore_mem>>
    %59 = tpu.memref_squeeze %58 : memref<1x!tpu.dma_semaphore, #tpu.memory_space<semaphore_mem>> -> memref<!tpu.dma_semaphore, #tpu.memory_space<semaphore_mem>>
    tpu.enqueue_dma source(%56 : memref<1x256xf32, #tpu.memory_space<any>>) target(%57 : memref<1x256xf32, #tpu.memory_space<vmem>>) target_semaphore(%59 : memref<!tpu.dma_semaphore, #tpu.memory_space<semaphore_mem>>)
    %c0_i32_34 = arith.constant 0 : i32
    %c0_i32_35 = arith.constant 0 : i32
    %c0_i32_36 = arith.constant 0 : i32
    %60 = tpu.memref_slice %arg3[%c0_i32_35, %c0_i32_36] : memref<8x256xf32, #tpu.memory_space<any>> -> memref<1x256xf32, #tpu.memory_space<any>>
    %c0_i32_37 = arith.constant 0 : i32
    %c0_i32_38 = arith.constant 0 : i32
    %61 = tpu.memref_slice %arg5[%c0_i32_37, %c0_i32_38] : memref<8x256xf32, #tpu.memory_space<vmem>> -> memref<1x256xf32, #tpu.memory_space<vmem>>
    %62 = tpu.memref_slice %arg6[%c0_i32_34] : memref<8x!tpu.dma_semaphore, #tpu.memory_space<semaphore_mem>> -> memref<1x!tpu.dma_semaphore, #tpu.memory_space<semaphore_mem>>
    %63 = tpu.memref_squeeze %62 : memref<1x!tpu.dma_semaphore, #tpu.memory_space<semaphore_mem>> -> memref<!tpu.dma_semaphore, #tpu.memory_space<semaphore_mem>>
    tpu.wait_dma2 semaphore(%63 : memref<!tpu.dma_semaphore, #tpu.memory_space<semaphore_mem>>) src(%60 : memref<1x256xf32, #tpu.memory_space<any>>) dst(%61 : memref<1x256xf32, #tpu.memory_space<vmem>>)
    %c1_i32_39 = arith.constant 1 : i32
    %c0_i32_40 = arith.constant 0 : i32
    %c0_i32_41 = arith.constant 0 : i32
    %64 = tpu.memref_slice %arg3[%c0_i32_40, %c0_i32_41] : memref<8x256xf32, #tpu.memory_space<any>> -> memref<1x256xf32, #tpu.memory_space<any>>
    %c1_i32_42 = arith.constant 1 : i32
    %c0_i32_43 = arith.constant 0 : i32
    %65 = tpu.memref_slice %arg5[%c1_i32_42, %c0_i32_43] : memref<8x256xf32, #tpu.memory_space<vmem>> -> memref<1x256xf32, #tpu.memory_space<vmem>>
    %66 = tpu.memref_slice %arg6[%c1_i32_39] : memref<8x!tpu.dma_semaphore, #tpu.memory_space<semaphore_mem>> -> memref<1x!tpu.dma_semaphore, #tpu.memory_space<semaphore_mem>>
    %67 = tpu.memref_squeeze %66 : memref<1x!tpu.dma_semaphore, #tpu.memory_space<semaphore_mem>> -> memref<!tpu.dma_semaphore, #tpu.memory_space<semaphore_mem>>
    tpu.wait_dma2 semaphore(%67 : memref<!tpu.dma_semaphore, #tpu.memory_space<semaphore_mem>>) src(%64 : memref<1x256xf32, #tpu.memory_space<any>>) dst(%65 : memref<1x256xf32, #tpu.memory_space<vmem>>)
    %c2_i32_44 = arith.constant 2 : i32
    %c0_i32_45 = arith.constant 0 : i32
    %c0_i32_46 = arith.constant 0 : i32
    %68 = tpu.memref_slice %arg3[%c0_i32_45, %c0_i32_46] : memref<8x256xf32, #tpu.memory_space<any>> -> memref<1x256xf32, #tpu.memory_space<any>>
    %c2_i32_47 = arith.constant 2 : i32
    %c0_i32_48 = arith.constant 0 : i32
    %69 = tpu.memref_slice %arg5[%c2_i32_47, %c0_i32_48] : memref<8x256xf32, #tpu.memory_space<vmem>> -> memref<1x256xf32, #tpu.memory_space<vmem>>
    %70 = tpu.memref_slice %arg6[%c2_i32_44] : memref<8x!tpu.dma_semaphore, #tpu.memory_space<semaphore_mem>> -> memref<1x!tpu.dma_semaphore, #tpu.memory_space<semaphore_mem>>
    %71 = tpu.memref_squeeze %70 : memref<1x!tpu.dma_semaphore, #tpu.memory_space<semaphore_mem>> -> memref<!tpu.dma_semaphore, #tpu.memory_space<semaphore_mem>>
    tpu.wait_dma2 semaphore(%71 : memref<!tpu.dma_semaphore, #tpu.memory_space<semaphore_mem>>) src(%68 : memref<1x256xf32, #tpu.memory_space<any>>) dst(%69 : memref<1x256xf32, #tpu.memory_space<vmem>>)
    %c3_i32_49 = arith.constant 3 : i32
    %c0_i32_50 = arith.constant 0 : i32
    %c0_i32_51 = arith.constant 0 : i32
    %72 = tpu.memref_slice %arg3[%c0_i32_50, %c0_i32_51] : memref<8x256xf32, #tpu.memory_space<any>> -> memref<1x256xf32, #tpu.memory_space<any>>
    %c3_i32_52 = arith.constant 3 : i32
    %c0_i32_53 = arith.constant 0 : i32
    %73 = tpu.memref_slice %arg5[%c3_i32_52, %c0_i32_53] : memref<8x256xf32, #tpu.memory_space<vmem>> -> memref<1x256xf32, #tpu.memory_space<vmem>>
    %74 = tpu.memref_slice %arg6[%c3_i32_49] : memref<8x!tpu.dma_semaphore, #tpu.memory_space<semaphore_mem>> -> memref<1x!tpu.dma_semaphore, #tpu.memory_space<semaphore_mem>>
    %75 = tpu.memref_squeeze %74 : memref<1x!tpu.dma_semaphore, #tpu.memory_space<semaphore_mem>> -> memref<!tpu.dma_semaphore, #tpu.memory_space<semaphore_mem>>
    tpu.wait_dma2 semaphore(%75 : memref<!tpu.dma_semaphore, #tpu.memory_space<semaphore_mem>>) src(%72 : memref<1x256xf32, #tpu.memory_space<any>>) dst(%73 : memref<1x256xf32, #tpu.memory_space<vmem>>)
    %c4_i32_54 = arith.constant 4 : i32
    %c0_i32_55 = arith.constant 0 : i32
    %c0_i32_56 = arith.constant 0 : i32
    %76 = tpu.memref_slice %arg3[%c0_i32_55, %c0_i32_56] : memref<8x256xf32, #tpu.memory_space<any>> -> memref<1x256xf32, #tpu.memory_space<any>>
    %c4_i32_57 = arith.constant 4 : i32
    %c0_i32_58 = arith.constant 0 : i32
    %77 = tpu.memref_slice %arg5[%c4_i32_57, %c0_i32_58] : memref<8x256xf32, #tpu.memory_space<vmem>> -> memref<1x256xf32, #tpu.memory_space<vmem>>
    %78 = tpu.memref_slice %arg6[%c4_i32_54] : memref<8x!tpu.dma_semaphore, #tpu.memory_space<semaphore_mem>> -> memref<1x!tpu.dma_semaphore, #tpu.memory_space<semaphore_mem>>
    %79 = tpu.memref_squeeze %78 : memref<1x!tpu.dma_semaphore, #tpu.memory_space<semaphore_mem>> -> memref<!tpu.dma_semaphore, #tpu.memory_space<semaphore_mem>>
    tpu.wait_dma2 semaphore(%79 : memref<!tpu.dma_semaphore, #tpu.memory_space<semaphore_mem>>) src(%76 : memref<1x256xf32, #tpu.memory_space<any>>) dst(%77 : memref<1x256xf32, #tpu.memory_space<vmem>>)
    %c5_i32_59 = arith.constant 5 : i32
    %c0_i32_60 = arith.constant 0 : i32
    %c0_i32_61 = arith.constant 0 : i32
    %80 = tpu.memref_slice %arg3[%c0_i32_60, %c0_i32_61] : memref<8x256xf32, #tpu.memory_space<any>> -> memref<1x256xf32, #tpu.memory_space<any>>
    %c5_i32_62 = arith.constant 5 : i32
    %c0_i32_63 = arith.constant 0 : i32
    %81 = tpu.memref_slice %arg5[%c5_i32_62, %c0_i32_63] : memref<8x256xf32, #tpu.memory_space<vmem>> -> memref<1x256xf32, #tpu.memory_space<vmem>>
    %82 = tpu.memref_slice %arg6[%c5_i32_59] : memref<8x!tpu.dma_semaphore, #tpu.memory_space<semaphore_mem>> -> memref<1x!tpu.dma_semaphore, #tpu.memory_space<semaphore_mem>>
    %83 = tpu.memref_squeeze %82 : memref<1x!tpu.dma_semaphore, #tpu.memory_space<semaphore_mem>> -> memref<!tpu.dma_semaphore, #tpu.memory_space<semaphore_mem>>
    tpu.wait_dma2 semaphore(%83 : memref<!tpu.dma_semaphore, #tpu.memory_space<semaphore_mem>>) src(%80 : memref<1x256xf32, #tpu.memory_space<any>>) dst(%81 : memref<1x256xf32, #tpu.memory_space<vmem>>)
    %c6_i32_64 = arith.constant 6 : i32
    %c0_i32_65 = arith.constant 0 : i32
    %c0_i32_66 = arith.constant 0 : i32
    %84 = tpu.memref_slice %arg3[%c0_i32_65, %c0_i32_66] : memref<8x256xf32, #tpu.memory_space<any>> -> memref<1x256xf32, #tpu.memory_space<any>>
    %c6_i32_67 = arith.constant 6 : i32
    %c0_i32_68 = arith.constant 0 : i32
    %85 = tpu.memref_slice %arg5[%c6_i32_67, %c0_i32_68] : memref<8x256xf32, #tpu.memory_space<vmem>> -> memref<1x256xf32, #tpu.memory_space<vmem>>
    %86 = tpu.memref_slice %arg6[%c6_i32_64] : memref<8x!tpu.dma_semaphore, #tpu.memory_space<semaphore_mem>> -> memref<1x!tpu.dma_semaphore, #tpu.memory_space<semaphore_mem>>
    %87 = tpu.memref_squeeze %86 : memref<1x!tpu.dma_semaphore, #tpu.memory_space<semaphore_mem>> -> memref<!tpu.dma_semaphore, #tpu.memory_space<semaphore_mem>>
    tpu.wait_dma2 semaphore(%87 : memref<!tpu.dma_semaphore, #tpu.memory_space<semaphore_mem>>) src(%84 : memref<1x256xf32, #tpu.memory_space<any>>) dst(%85 : memref<1x256xf32, #tpu.memory_space<vmem>>)
    %c7_i32_69 = arith.constant 7 : i32
    %c0_i32_70 = arith.constant 0 : i32
    %c0_i32_71 = arith.constant 0 : i32
    %88 = tpu.memref_slice %arg3[%c0_i32_70, %c0_i32_71] : memref<8x256xf32, #tpu.memory_space<any>> -> memref<1x256xf32, #tpu.memory_space<any>>
    %c7_i32_72 = arith.constant 7 : i32
    %c0_i32_73 = arith.constant 0 : i32
    %89 = tpu.memref_slice %arg5[%c7_i32_72, %c0_i32_73] : memref<8x256xf32, #tpu.memory_space<vmem>> -> memref<1x256xf32, #tpu.memory_space<vmem>>
    %90 = tpu.memref_slice %arg6[%c7_i32_69] : memref<8x!tpu.dma_semaphore, #tpu.memory_space<semaphore_mem>> -> memref<1x!tpu.dma_semaphore, #tpu.memory_space<semaphore_mem>>
    %91 = tpu.memref_squeeze %90 : memref<1x!tpu.dma_semaphore, #tpu.memory_space<semaphore_mem>> -> memref<!tpu.dma_semaphore, #tpu.memory_space<semaphore_mem>>
    tpu.wait_dma2 semaphore(%91 : memref<!tpu.dma_semaphore, #tpu.memory_space<semaphore_mem>>) src(%88 : memref<1x256xf32, #tpu.memory_space<any>>) dst(%89 : memref<1x256xf32, #tpu.memory_space<vmem>>)
    %c0 = arith.constant 0 : index
    %c0_74 = arith.constant 0 : index
    %92 = vector.load %arg2[%c0, %c0_74] : memref<8x256xf32, #tpu.memory_space<vmem>>, vector<8x256xf32>
    %c0_75 = arith.constant 0 : index
    %c0_76 = arith.constant 0 : index
    %93 = vector.load %arg5[%c0_75, %c0_76] : memref<8x256xf32, #tpu.memory_space<vmem>>, vector<8x256xf32>
    %94 = arith.mulf %92, %92 : vector<8x256xf32>
    %cst = arith.constant dense<0.000000e+00> : vector<8xf32>
    %95 = vector.multi_reduction <add>, %94, %cst [1] : vector<8x256xf32> to vector<8xf32>
    %96 = vector.shape_cast %95 : vector<8xf32> to vector<8x1xf32>
    %97 = arith.mulf %93, %93 : vector<8x256xf32>
    %cst_77 = arith.constant dense<0.000000e+00> : vector<8xf32>
    %98 = vector.multi_reduction <add>, %97, %cst_77 [1] : vector<8x256xf32> to vector<8xf32>
    %99 = vector.shape_cast %98 : vector<8xf32> to vector<8x1xf32>
    %100 = arith.mulf %92, %93 : vector<8x256xf32>
    %cst_78 = arith.constant dense<0.000000e+00> : vector<8xf32>
    %101 = vector.multi_reduction <add>, %100, %cst_78 [1] : vector<8x256xf32> to vector<8xf32>
    %102 = vector.shape_cast %101 : vector<8xf32> to vector<8x1xf32>
    %103 = arith.addf %96, %99 : vector<8x1xf32>
    %cst_79 = arith.constant 2.000000e+00 : f32
    %104 = vector.broadcast %cst_79 : f32 to vector<8x1xf32>
    %105 = arith.mulf %104, %102 : vector<8x1xf32>
    %106 = arith.subf %103, %105 : vector<8x1xf32>
    %cst_80 = arith.constant 9.99999996E-13 : f32
    %cst_81 = arith.constant 9.99999995E+11 : f32
    %107 = vector.broadcast %cst_80 : f32 to vector<8x1xf32>
    %108 = arith.maximumf %107, %106 : vector<8x1xf32>
    %109 = vector.broadcast %cst_81 : f32 to vector<8x1xf32>
    %110 = arith.minimumf %109, %108 : vector<8x1xf32>
    %111 = tpu.iota {dimensions = array<i32: 0>} : vector<8x1xi32>
    %112 = vector.broadcast %0 : i32 to vector<8x1xi32>
    %113 = arith.addi %112, %111 : vector<8x1xi32>
    %c16_i32 = arith.constant 16 : i32
    %114 = vector.broadcast %c16_i32 : i32 to vector<8x1xi32>
    %115 = arith.cmpi slt, %113, %114 : vector<8x1xi32>
    %cst_82 = arith.constant 0.000000e+00 : f32
    %116 = vector.broadcast %cst_82 : f32 to vector<8x1xf32>
    %117 = arith.select %115, %110, %116 : vector<8x1xi1>, vector<8x1xf32>
    %118 = vector.shape_cast %117 : vector<8x1xf32> to vector<1x8x1xf32>
    %cst_83 = arith.constant dense<0.000000e+00> : vector<1xf32>
    %119 = vector.multi_reduction <add>, %118, %cst_83 [1, 2] : vector<1x8x1xf32> to vector<1xf32>
    %120 = vector.shape_cast %119 : vector<1xf32> to vector<1x1x1xf32>
    %121 = vector.extract %120[0, 0, 0] : f32 from vector<1x1x1xf32>
    %c0_84 = arith.constant 0 : index
    %122 = memref.load %arg7[%c0_84] : memref<1xf32, #tpu.memory_space<smem>>
    %123 = arith.addf %122, %121 : f32
    %c0_85 = arith.constant 0 : index
    %124 = memref.load %arg7[%c0_85] : memref<1xf32, #tpu.memory_space<smem>>
    memref.store %123, %arg7[%c0_85] : memref<1xf32, #tpu.memory_space<smem>>
    %c0_86 = arith.constant 0 : index
    %125 = memref.load %arg7[%c0_86] : memref<1xf32, #tpu.memory_space<smem>>
    %cst_87 = arith.constant 1.120000e-10 : f32
    %126 = arith.addf %125, %cst_87 : f32
    %cst_88 = arith.constant 1.600000e+01 : f32
    %127 = arith.divf %126, %cst_88 : f32
    %c0_89 = arith.constant 0 : index
    %c0_90 = arith.constant 0 : index
    %128 = memref.load %arg4[%c0_89, %c0_90] : memref<1x1xf32, #tpu.memory_space<smem>>
    memref.store %127, %arg4[%c0_89, %c0_90] : memref<1x1xf32, #tpu.memory_space<smem>>
    return
  }
  func.func @transform_0(%arg0: i32, %arg1: memref<16xi32, #tpu.memory_space<smem>>) -> (i32, i32) {
    %c0_i32 = arith.constant 0 : i32
    %c0_i32_0 = arith.constant 0 : i32
    return %arg0, %c0_i32 : i32, i32
  }
  func.func @transform_2(%arg0: i32, %arg1: memref<16xi32, #tpu.memory_space<smem>>) -> (i32, i32) {
    %c0_i32 = arith.constant 0 : i32
    %c0_i32_0 = arith.constant 0 : i32
    %c0_i32_1 = arith.constant 0 : i32
    return %c0_i32, %c0_i32_0 : i32, i32
  }
}

</mosaic_0001>

<bundles_post_ra>
// kernel: tpu_custom_call.1
= control target key start
LH: loop header
LB: loop body
LE: loop exit
PB: predicated region body
PF: predicated region fallthrough
CT: control target
= control target key end

     0   :  { %s1206_s0 = inlined_call_operand.hbm [shape: s32[16], index: 0, kind: input, shape index: {}]   ;;  %s1207_s1 = inlined_call_operand.hbm [shape: f32[16,256], index: 1, kind: input, shape index: {}]   ;;  %s1208_s2 = inlined_call_operand.hbm [shape: f32[8,256], index: 2, kind: input, shape index: {}]   ;;  %s1209_s3 = inlined_call_operand.hbm [shape: f32[1,1], index: 3, kind: output, shape index: {}]  }
   0x1   :  { %1212 = sst [smem:[#allocation32_spill]] %s1207_s1  ;;  %s565_s14 = scalar_lea.hbm %s1206_s0, 16 }
   0x2   :  { %p566_p0 = scmp.ne.s32.totalorder %s1206_s0, %s565_s14  ;;  %p569_p1 = scmp.lt.u32.totalorder %s565_s14, %s1206_s0 }
   0x4   :  { %p571_p2 = pnand %p569_p1, %p566_p0 }
   0x6   :  { %574 = shalt.err (!%p571_p2)  }
   0x7   :  { %s867_s19 = smov [#allocation6]  }
   0x8   :  { %9 = dma.hbm_to_smem %s1206_s0, 16, %s867_s19, [#allocation5] }
   0x9   :  { %825 = dma.done.wait [#allocation5], 16 }
   0xa   :  { %826 = vsyncadd [#allocation5], 4294967280 }
   0xb   :  { %11 = sfence }
   0xc   :  { %12 = vsyncpa [#allocation8], 0 }
   0xd   :  { %14 = vsyncpa [#allocation8 + $0x1], 0 }
   0xe   :  { %15 = vsyncpa [#allocation9], 0  ;;  %s913_s22 = smov 0   ;;  %s915_s23 = smov 0  }
   0xf   :  { %s917_s24 = smov 0   ;;  %s919_s25 = smov 0  }
  0x10 LB: > { %1213 = sst [smem:[#allocation30_spill]] %s861_s24  ;;  %s932_s0 = sadd.s32 4294967295, %s865_s25   ;;  %s865_s25 = sphi %s919_s25, %s1227_s25   ;;  %s861_s24 = sphi %s917_s24, %s1224_s24   ;;  %s857_s23 = sphi %s915_s23, %s1226_s23   ;;  %s853_s22 = sphi %s913_s22, %s1225_s22  }
  0x11   : > { %s935_s26 = sadd.s32 1, %s865_s25   ;;  %s28_s28 = sadd.s32 1, %s861_s24 }
  0x12   : > { %s25_s27 = ssub.s32 %s865_s25, %s935_s26  ;;  %p35_p4 = scmp.ne.s32.totalorder %s861_s24, %s857_s23 }
  0x13   : > { %p26_p3 = scmp.eq.s32.totalorder %s25_s27, 0  ;;  %p36_p5 = scmp.eq.s32.totalorder %s865_s25, 0 }
  0x14   : > { %p41_p6 = scmp.ne.s32.totalorder %s857_s23, %s853_s22  ;;  %p1210_p8 = scmp.eq.s32.totalorder %s932_s0, 0 }
  0x15   : > { %s945_s29 = scalar_select %p26_p3, %s861_s24, %s28_s28  }
  0x16   : > { %p37_p7 = por %p36_p5, %p35_p4  ;;  %p516_p9 = scmp.lt.s32.totalorder %s865_s25, 2 }
  0x17   : > { %1214 = sst [smem:[#allocation31_spill]] %s945_s29  ;;  %p951_p10 = por %p1210_p8, %p41_p6 }
  0x18   : > { %s86_s4 = sand.u32 1, %s861_s24   ;;  %s501_s6 = sshll.u32 %s865_s25, 8 }
  0x19   : > { %s466_s5 = sshll.u32 %s86_s4, 4  ;;  %s1216_s1 = sld [smem:[#allocation32_spill]] }
  0x1a   : > { %s90_s10 = scalar_lea.vmem [#allocation7], %s466_s5  ;;  %p964_p11 = pnand %p516_p9, %p37_p7 }
  0x1b   : > { %s98_s11 = sshll.u32 %s90_s10, 4  ;;  %s87_s13 = scalar_lea.sflag [#allocation8], %s86_s4  ;;  %s962_s11 = int_to_ptr.vmem [resolvable:$true] %s98_s11 }
  0x1c   : > { %p577_p1 = pneg %p964_p11 }
  0x1f   : > { %s960_s9 = scalar_lea.hbm %s1216_s1, %s501_s6  ;;  %s580_s17 = scalar_lea.hbm %s1216_s1, 512 }
  0x20   : > { %s575_s14 = scalar_lea.hbm %s960_s9, 256  ;;  %p581_p4 = scmp.lt.u32.totalorder %s960_s9, %s1216_s1 }
  0x21   : > { %p576_p0 = scmp.ne.s32.totalorder %s960_s9, %s575_s14  ;;  %p582_p5 = scmp.lt.u32.totalorder %s580_s17, %s575_s14 }
  0x22   : > { %p584_p7 = scmp.lt.u32.totalorder %s575_s14, %s960_s9 }
  0x23   : > { %p578_p2 = pnand %p577_p1, %p576_p0  ;;  %p583_p6 = por %p582_p5, %p581_p4 }
  0x25   : > { %p579_p3 = pneg %p578_p2  ;;  %p585_p9 = por %p584_p7, %p583_p6 }
  0x27   : > { %p586_p8 = pnand %p585_p9, %p579_p3 }
  0x29   : > { %589 = shalt.err (!%p586_p8)
}
  0x2a   : > { %s590_s20 = scalar_lea.vmem %s962_s11, 256  ;;  %s868_s21 = smov [#allocation7]  }
  0x2b   : > { %p591_p0 = scmp.ne.s32.totalorder %s962_s11, %s590_s20  ;;  %s595_s22 = sshll.u32 %s868_s21, 4  ;;  %s596_s22 = int_to_ptr.vmem [resolvable:$false] %s595_s22 }
  0x2c   : > { %s597_s27 = scalar_lea.vmem %s596_s22, 512  ;;  %p598_p13 = scmp.lt.s32.totalorder %s962_s11, %s596_s22 }
  0x2d   : > { %p593_p2 = pnand %p591_p0, %p577_p1  ;;  %p599_p4 = scmp.lt.s32.totalorder %s597_s27, %s590_s20 }
  0x2f   : > { %p594_p12 = pneg %p593_p2  ;;  %p600_p5 = por %p599_p4, %p598_p13 }
  0x31   : > { %p601_p6 = pnand %p600_p5, %p594_p12 }
  0x33   : > { %604 = shalt.err (!%p601_p6)
}
  0x34   : > { %515 = dma.hbm_to_vmem [thread:$0]  (!%p964_p11), %s960_s9, 256, %s962_s11, %s87_s13  }
  0x35   : > { %p1218_p8 = scmp.lt.s32.totalorder %s865_s25, 3  ;;  %p1219_p3 = scmp.ge.s32.totalorder %s865_s25, 1 }
  0x37   : > { %p104_p1 = pnand %p1219_p3, %p1218_p8 }
  0x38   : > { %s109_s28 = sand.u32 (!%p104_p1), 1, %s857_s23  }
  0x39   : > { %107 = sbr.rel (%p104_p1) target bundleno = 663 (0x297), region = 24  ;;  %s1000_s4 = sshll.u32 (!%p104_p1), %s109_s28, 4 }
  0x3a   : > { %s110_s5 = scalar_lea.sflag (!%p104_p1), [#allocation8], %s109_s28 }
  0x40   : > { %828 = dma.done.wait (%p951_p10), %s110_s5, 256  }
  0x41   : > { %830 = vsyncadd (%p951_p10), %s110_s5, 4294967040  ;;  %s1008_s7 = sshll.u32 %s932_s0, 3  ;;  %s869_s25 = smov 0.0  }
  0x42   : > { %p1220_p11 = scmp.eq.s32.totalorder %s932_s0, 0  ;;  %s134_s8 = sld [smem:[#allocation6 + %s1008_s7]] }
  0x43   : > { %s870_s9 = smov [#allocation2]   ;;  %s146_s11 = sadd.s32 1, %s1008_s7 }
  0x44   : > { %507 = sst [smem:[#allocation4]] (%p1220_p11), %s869_s25  ;;  %s142_s10 = sshll.u32 %s870_s9, 4  ;;  %s1013_s10 = int_to_ptr.vmem [resolvable:$true] %s142_s10 }
  0x45   : > { %s1016_s12 = sld [smem:[#allocation6 + %s146_s11]]  ;;  %s871_s30 = smov [#allocation2 + $0x1]  }
  0x46   : > { %s157_s13 = sshll.u32 %s871_s30, 4  ;;  %s161_s14 = sadd.s32 2, %s1008_s7  ;;  %s1018_s13 = int_to_ptr.vmem [resolvable:$true] %s157_s13 }
  0x47   : > { %s1021_s18 = sld [smem:[#allocation6 + %s161_s14]]  ;;  %s872_s21 = smov [#allocation2 + $0x2]  }
  0x48   : > { %s135_s15 = sshrl.u32 %s134_s8, 3  ;;  %s136_s16 = sand.u32 7, %s134_s8  }
  0x49   : > { %s473_s17 = sshll.u32 %s135_s15, 4  ;;  %s1023_s22 = sshll.u32 %s872_s21, 4  ;;  %s173_s22 = int_to_ptr.vmem [resolvable:$true] %s1023_s22 }
  0x4a   : > { %s138_s19 = sadd.s32 %s473_s17, %s136_s16  ;;  %s1032_s6 = scalar_lea.hbm %s1208_s2, 256 }
  0x4b   : > { %s474_s20 = sshll.u32 %s138_s19, 4  ;;  %s148_s25 = sshrl.u32 %s1016_s12, 3 }
  0x4c   : > { %s140_s5 = scalar_lea.hbm %s1208_s2, %s474_s20 }
  0x4d   : > { %s605_s9 = scalar_lea.hbm %s140_s5, 32  ;;  %p608_p12 = scmp.lt.u32.totalorder %s140_s5, %s1208_s2 }
  0x4e   : > { %p606_p10 = scmp.ne.s32.totalorder %s140_s5, %s605_s9  ;;  %p609_p13 = scmp.lt.u32.totalorder %s1032_s6, %s605_s9 }
  0x4f   : > { %p611_p9 = scmp.lt.u32.totalorder %s605_s9, %s140_s5 }
  0x50   : > { %p610_p7 = por %p609_p13, %p608_p12 }
  0x52   : > { %p612_p0 = por %p611_p9, %p610_p7 }
  0x54   : > { %p613_p2 = pnand %p612_p0, %p606_p10 }
  0x56   : > { %616 = shalt.err (!%p613_p2)  }
  0x57   : > { %s617_s15 = scalar_lea.vmem %s1013_s10, 32  ;;  %s1041_s16 = scalar_lea.vmem %s1013_s10, 256 }
  0x58   : > { %p618_p4 = scmp.ne.s32.totalorder %s1013_s10, %s617_s15  ;;  %p622_p5 = scmp.lt.s32.totalorder %s1013_s10, %s1013_s10 }
  0x59   : > { %p623_p6 = scmp.lt.s32.totalorder %s1041_s16, %s617_s15 }
  0x5b   : > { %p624_p8 = por %p623_p6, %p622_p5 }
  0x5d   : > { %p625_p3 = pnand %p624_p8, %p618_p4 }
  0x5f   : > { %628 = shalt.err (!%p625_p3)  }
  0x60   : > { %s873_s17 = smov 128   ;;  %s874_s19 = smov 1  }
  0x61   : > { %145 = dma.hbm_to_vmem [thread:$0]  %s140_s5, 32, %s1013_s10, [#allocation3], %s873_s17, %s873_s17, %s874_s19 }
  0x62   : > { %s149_s20 = sand.u32 7, %s1016_s12   ;;  %s475_s21 = sshll.u32 %s148_s25, 4 }
  0x63   : > { %s151_s27 = sadd.s32 %s475_s21, %s149_s20  ;;  %s163_s28 = sshrl.u32 %s1021_s18, 3 }
  0x64   : > { %s476_s9 = sshll.u32 %s151_s27, 4  ;;  %s164_s11 = sand.u32 7, %s1021_s18  }
  0x65   : > { %s153_s14 = scalar_lea.hbm %s1208_s2, %s476_s9  ;;  %s477_s15 = sshll.u32 %s163_s28, 4 }
  0x66   : > { %s629_s1 = scalar_lea.hbm %s153_s14, 32  ;;  %p632_p11 = scmp.lt.u32.totalorder %s153_s14, %s1208_s2 }
  0x67   : > { %p630_p1 = scmp.ne.s32.totalorder %s153_s14, %s629_s1  ;;  %p633_p10 = scmp.lt.u32.totalorder %s1032_s6, %s629_s1 }
  0x68   : > { %p635_p13 = scmp.lt.u32.totalorder %s629_s1, %s153_s14 }
  0x69   : > { %p634_p12 = por %p633_p10, %p632_p11 }
  0x6b   : > { %p636_p7 = por %p635_p13, %p634_p12 }
  0x6d   : > { %p637_p9 = pnand %p636_p7, %p630_p1 }
  0x6f   : > { %640 = shalt.err (!%p637_p9)  }
  0x70   : > { %s641_s12 = scalar_lea.vmem %s1018_s13, 32  ;;  %p646_p2 = scmp.lt.s32.totalorder %s1018_s13, %s1013_s10 }
  0x71   : > { %p642_p0 = scmp.ne.s32.totalorder %s1018_s13, %s641_s12  ;;  %p647_p4 = scmp.lt.s32.totalorder %s1041_s16, %s641_s12 }
  0x73   : > { %p648_p5 = por %p647_p4, %p646_p2 }
  0x75   : > { %p649_p6 = pnand %p648_p5, %p642_p0 }
  0x77   : > { %652 = shalt.err (!%p649_p6)  }
  0x78   : > { %160 = dma.hbm_to_vmem [thread:$0]  %s153_s14, 32, %s1018_s13, [#allocation3 + $0x1], %s873_s17, %s873_s17, %s874_s19 }
  0x79   : > { %s166_s1 = sadd.s32 %s477_s15, %s164_s11  ;;  %s176_s29 = sadd.s32 3, %s1008_s7 }
  0x7a   : > { %s478_s24 = sshll.u32 %s166_s1, 4  ;;  %s1074_s20 = sld [smem:[#allocation6 + %s176_s29]] }
  0x7b   : > { %s168_s25 = scalar_lea.hbm %s1208_s2, %s478_s24 }
  0x7c   : > { %s653_s21 = scalar_lea.hbm %s168_s25, 32  ;;  %p656_p3 = scmp.lt.u32.totalorder %s168_s25, %s1208_s2 }
  0x7d   : > { %p654_p8 = scmp.ne.s32.totalorder %s168_s25, %s653_s21  ;;  %p657_p1 = scmp.lt.u32.totalorder %s1032_s6, %s653_s21 }
  0x7e   : > { %p659_p10 = scmp.lt.u32.totalorder %s653_s21, %s168_s25 }
  0x7f   : > { %p658_p11 = por %p657_p1, %p656_p3 }
  0x81   : > { %p660_p12 = por %p659_p10, %p658_p11 }
  0x83   : > { %p661_p13 = pnand %p660_p12, %p654_p8 }
  0x85   : > { %664 = shalt.err (!%p661_p13)  }
  0x86   : > { %s665_s13 = scalar_lea.vmem %s173_s22, 32  ;;  %p670_p9 = scmp.lt.s32.totalorder %s173_s22, %s1013_s10 }
  0x87   : > { %p666_p7 = scmp.ne.s32.totalorder %s173_s22, %s665_s13  ;;  %p671_p0 = scmp.lt.s32.totalorder %s1041_s16, %s665_s13 }
  0x89   : > { %p672_p2 = por %p671_p0, %p670_p9 }
  0x8b   : > { %p673_p4 = pnand %p672_p2, %p666_p7 }
  0x8d   : > { %676 = shalt.err (!%p673_p4)  }
  0x8e   : > { %175 = dma.hbm_to_vmem [thread:$0]  %s168_s25, 32, %s173_s22, [#allocation3 + $0x2], %s873_s17, %s873_s17, %s874_s19 }
  0x8f   : > { %s191_s9 = sadd.s32 4, %s1008_s7  ;;  %s875_s11 = smov [#allocation2 + $0x3]  }
  0x90   : > { %s187_s30 = sshll.u32 %s875_s11, 4  ;;  %s1086_s8 = sld [smem:[#allocation6 + %s191_s9]]  ;;  %s1088_s30 = int_to_ptr.vmem [resolvable:$true] %s187_s30 }
  0x91   : > { %s876_s14 = smov [#allocation2 + $0x4]   ;;  %s206_s12 = sadd.s32 5, %s1008_s7 }
  0x92   : > { %s202_s15 = sshll.u32 %s876_s14, 4  ;;  %s178_s1 = sshrl.u32 %s1074_s20, 3  ;;  %s1093_s15 = int_to_ptr.vmem [resolvable:$true] %s202_s15 }
  0x93   : > { %s179_s24 = sand.u32 7, %s1074_s20   ;;  %s479_s29 = sshll.u32 %s178_s1, 4 }
  0x94   : > { %s181_s18 = sadd.s32 %s479_s29, %s179_s24  ;;  %s1095_s22 = sld [smem:[#allocation6 + %s206_s12]] }
  0x95   : > { %s480_s5 = sshll.u32 %s181_s18, 4 }
  0x96   : > { %s193_s25 = sshrl.u32 %s1086_s8, 3  ;;  %s183_s28 = scalar_lea.hbm %s1208_s2, %s480_s5 }
  0x97   : > { %s194_s13 = sand.u32 7, %s1086_s8   ;;  %s677_s9 = scalar_lea.hbm %s183_s28, 32 }
  0x98   : > { %p678_p5 = scmp.ne.s32.totalorder %s183_s28, %s677_s9  ;;  %p680_p6 = scmp.lt.u32.totalorder %s183_s28, %s1208_s2 }
  0x99   : > { %p681_p8 = scmp.lt.u32.totalorder %s1032_s6, %s677_s9  ;;  %p683_p1 = scmp.lt.u32.totalorder %s677_s9, %s183_s28 }
  0x9b   : > { %p682_p3 = por %p681_p8, %p680_p6 }
  0x9d   : > { %p684_p11 = por %p683_p1, %p682_p3 }
  0x9f   : > { %p685_p10 = pnand %p684_p11, %p678_p5 }
  0xa1   : > { %688 = shalt.err (!%p685_p10)  }
  0xa2   : > { %s689_s20 = scalar_lea.vmem %s1088_s30, 32  ;;  %p694_p13 = scmp.lt.s32.totalorder %s1088_s30, %s1013_s10 }
  0xa3   : > { %p690_p12 = scmp.ne.s32.totalorder %s1088_s30, %s689_s20  ;;  %p695_p7 = scmp.lt.s32.totalorder %s1041_s16, %s689_s20 }
  0xa5   : > { %p696_p9 = por %p695_p7, %p694_p13 }
  0xa7   : > { %p697_p0 = pnand %p696_p9, %p690_p12 }
  0xa9   : > { %700 = shalt.err (!%p697_p0)  }
  0xaa   : > { %190 = dma.hbm_to_vmem [thread:$0]  %s183_s28, 32, %s1088_s30, [#allocation3 + $0x3], %s873_s17, %s873_s17, %s874_s19 }
  0xab   : > { %s481_s8 = sshll.u32 %s193_s25, 4  ;;  %s877_s1 = smov [#allocation2 + $0x5]  }
  0xac   : > { %s196_s12 = sadd.s32 %s481_s8, %s194_s13  ;;  %s217_s24 = sshll.u32 %s877_s1, 4  ;;  %s218_s24 = int_to_ptr.vmem [resolvable:$true] %s217_s24 }
  0xad   : > { %s482_s29 = sshll.u32 %s196_s12, 4  ;;  %s208_s18 = sshrl.u32 %s1095_s22, 3 }
  0xae   : > { %s198_s27 = scalar_lea.hbm %s1208_s2, %s482_s29  ;;  %s209_s9 = sand.u32 7, %s1095_s22  }
  0xaf   : > { %s701_s11 = scalar_lea.hbm %s198_s27, 32  ;;  %p704_p4 = scmp.lt.u32.totalorder %s198_s27, %s1208_s2 }
  0xb0   : > { %p702_p2 = scmp.ne.s32.totalorder %s198_s27, %s701_s11  ;;  %p705_p5 = scmp.lt.u32.totalorder %s1032_s6, %s701_s11 }
  0xb1   : > { %p707_p8 = scmp.lt.u32.totalorder %s701_s11, %s198_s27 }
  0xb2   : > { %p706_p6 = por %p705_p5, %p704_p4 }
  0xb4   : > { %p708_p3 = por %p707_p8, %p706_p6 }
  0xb6   : > { %p709_p1 = pnand %p708_p3, %p702_p2 }
  0xb8   : > { %712 = shalt.err (!%p709_p1)  }
  0xb9   : > { %s713_s30 = scalar_lea.vmem %s1093_s15, 32  ;;  %p718_p10 = scmp.lt.s32.totalorder %s1093_s15, %s1013_s10 }
  0xba   : > { %p714_p11 = scmp.ne.s32.totalorder %s1093_s15, %s713_s30  ;;  %p719_p12 = scmp.lt.s32.totalorder %s1041_s16, %s713_s30 }
  0xbc   : > { %p720_p13 = por %p719_p12, %p718_p10 }
  0xbe   : > { %p721_p7 = pnand %p720_p13, %p714_p11 }
  0xc0   : > { %724 = shalt.err (!%p721_p7)  }
  0xc1   : > { %205 = dma.hbm_to_vmem [thread:$0]  %s198_s27, 32, %s1093_s15, [#allocation3 + $0x4], %s873_s17, %s873_s17, %s874_s19 }
  0xc2   : > { %s483_s22 = sshll.u32 %s208_s18, 4  ;;  %s221_s28 = sadd.s32 6, %s1008_s7 }
  0xc3   : > { %s211_s25 = sadd.s32 %s483_s22, %s209_s9  ;;  %s222_s8 = sld [smem:[#allocation6 + %s221_s28]] }
  0xc4   : > { %s484_s13 = sshll.u32 %s211_s25, 4 }
  0xc5   : > { %s213_s29 = scalar_lea.hbm %s1208_s2, %s484_s13 }
  0xc6   : > { %s725_s5 = scalar_lea.hbm %s213_s29, 32  ;;  %p728_p0 = scmp.lt.u32.totalorder %s213_s29, %s1208_s2 }
  0xc7   : > { %p726_p9 = scmp.ne.s32.totalorder %s213_s29, %s725_s5  ;;  %p729_p2 = scmp.lt.u32.totalorder %s1032_s6, %s725_s5 }
  0xc8   : > { %p731_p5 = scmp.lt.u32.totalorder %s725_s5, %s213_s29 }
  0xc9   : > { %p730_p4 = por %p729_p2, %p728_p0 }
  0xcb   : > { %p732_p6 = por %p731_p5, %p730_p4 }
  0xcd   : > { %p733_p8 = pnand %p732_p6, %p726_p9 }
  0xcf   : > { %736 = shalt.err (!%p733_p8)  }
  0xd0   : > { %s737_s15 = scalar_lea.vmem %s218_s24, 32  ;;  %p742_p1 = scmp.lt.s32.totalorder %s218_s24, %s1013_s10 }
  0xd1   : > { %p738_p3 = scmp.ne.s32.totalorder %s218_s24, %s737_s15  ;;  %p743_p11 = scmp.lt.s32.totalorder %s1041_s16, %s737_s15 }
  0xd3   : > { %p744_p10 = por %p743_p11, %p742_p1 }
  0xd5   : > { %p745_p12 = pnand %p744_p10, %p738_p3 }
  0xd7   : > { %748 = shalt.err (!%p745_p12)  }
  0xd8   : > { %220 = dma.hbm_to_vmem [thread:$0]  %s213_s29, 32, %s218_s24, [#allocation3 + $0x5], %s873_s17, %s873_s17, %s874_s19 }
  0xd9   : > { %s236_s18 = sadd.s32 7, %s1008_s7  ;;  %s878_s9 = smov [#allocation2 + $0x6]  }
  0xda   : > { %s1147_s27 = sld [smem:[#allocation6 + %s236_s18]]  ;;  %s232_s14 = sshll.u32 %s878_s9, 4  ;;  %s233_s14 = int_to_ptr.vmem [resolvable:$true] %s232_s14 }
  0xdb   : > { %s223_s20 = sshrl.u32 %s222_s8, 3  ;;  %s224_s30 = sand.u32 7, %s222_s8  }
  0xdc   : > { %s485_s22 = sshll.u32 %s223_s20, 4  ;;  %s879_s13 = smov [#allocation2 + $0x7]  }
  0xdd   : > { %s226_s25 = sadd.s32 %s485_s22, %s224_s30  ;;  %s247_s12 = sshll.u32 %s879_s13, 4  ;;  %s248_s12 = int_to_ptr.vmem [resolvable:$true] %s247_s12 }
  0xde   : > { %s486_s28 = sshll.u32 %s226_s25, 4 }
  0xdf   : > { %s228_s21 = scalar_lea.hbm %s1208_s2, %s486_s28 }
  0xe0   : > { %s238_s24 = sshrl.u32 %s1147_s27, 3  ;;  %s749_s29 = scalar_lea.hbm %s228_s21, 32 }
  0xe1   : > { %p750_p13 = scmp.ne.s32.totalorder %s228_s21, %s749_s29  ;;  %p752_p7 = scmp.lt.u32.totalorder %s228_s21, %s1208_s2 }
  0xe2   : > { %p753_p9 = scmp.lt.u32.totalorder %s1032_s6, %s749_s29  ;;  %p755_p2 = scmp.lt.u32.totalorder %s749_s29, %s228_s21 }
  0xe4   : > { %p754_p0 = por %p753_p9, %p752_p7 }
  0xe6   : > { %p756_p4 = por %p755_p2, %p754_p0 }
  0xe8   : > { %p757_p5 = pnand %p756_p4, %p750_p13 }
  0xea   : > { %760 = shalt.err (!%p757_p5)  }
  0xeb   : > { %s761_s8 = scalar_lea.vmem %s233_s14, 32  ;;  %p766_p8 = scmp.lt.s32.totalorder %s233_s14, %s1013_s10 }
  0xec   : > { %p762_p6 = scmp.ne.s32.totalorder %s233_s14, %s761_s8  ;;  %p767_p3 = scmp.lt.s32.totalorder %s1041_s16, %s761_s8 }
  0xee   : > { %p768_p1 = por %p767_p3, %p766_p8 }
  0xf0   : > { %p769_p11 = pnand %p768_p1, %p762_p6 }
  0xf2   : > { %772 = shalt.err (!%p769_p11)  }
  0xf3   : > { %235 = dma.hbm_to_vmem [thread:$0]  %s228_s21, 32, %s233_s14, [#allocation3 + $0x6], %s873_s17, %s873_s17, %s874_s19 }
  0xf4   : > { %s239_s18 = sand.u32 7, %s1147_s27   ;;  %s487_s9 = sshll.u32 %s238_s24, 4 }
  0xf5   : > { %s241_s20 = sadd.s32 %s487_s9, %s239_s18 }
  0xf6   : > { %s488_s30 = sshll.u32 %s241_s20, 4 }
  0xf7   : > { %s243_s28 = scalar_lea.hbm %s1208_s2, %s488_s30 }
  0xf8   : > { %s773_s13 = scalar_lea.hbm %s243_s28, 32  ;;  %p776_p12 = scmp.lt.u32.totalorder %s243_s28, %s1208_s2 }
  0xf9   : > { %p774_p10 = scmp.ne.s32.totalorder %s243_s28, %s773_s13  ;;  %p777_p13 = scmp.lt.u32.totalorder %s1032_s6, %s773_s13 }
  0xfa   : > { %p779_p9 = scmp.lt.u32.totalorder %s773_s13, %s243_s28 }
  0xfb   : > { %p778_p7 = por %p777_p13, %p776_p12 }
  0xfd   : > { %p780_p0 = por %p779_p9, %p778_p7 }
  0xff   : > { %p781_p2 = pnand %p780_p0, %p774_p10 }
 0x101   : > { %784 = shalt.err (!%p781_p2)  }
 0x102   : > { %s785_s27 = scalar_lea.vmem %s248_s12, 32  ;;  %p790_p5 = scmp.lt.s32.totalorder %s248_s12, %s1013_s10 }
 0x103   : > { %p786_p4 = scmp.ne.s32.totalorder %s248_s12, %s785_s27  ;;  %p791_p6 = scmp.lt.s32.totalorder %s1041_s16, %s785_s27 }
 0x105   : > { %p792_p8 = por %p791_p6, %p790_p5 }
 0x107   : > { %p793_p3 = pnand %p792_p8, %p786_p4 }
 0x109   : > { %796 = shalt.err (!%p793_p3)  }
 0x10a   : > { %250 = dma.hbm_to_vmem [thread:$0]  %s243_s28, 32, %s248_s12, [#allocation3 + $0x7], %s873_s17, %s873_s17, %s874_s19 }
 0x10b   : > { %831 = dma.done.wait [#allocation3], 32 }
 0x10c   : > { %832 = vsyncadd [#allocation3], 4294967264 }
 0x10d   : > { %833 = dma.done.wait [#allocation3 + $0x1], 32 }
 0x10e   : > { %834 = vsyncadd [#allocation3 + $0x1], 4294967264 }
 0x10f   : > { %835 = dma.done.wait [#allocation3 + $0x2], 32 }
 0x110   : > { %836 = vsyncadd [#allocation3 + $0x2], 4294967264 }
 0x111   : > { %837 = dma.done.wait [#allocation3 + $0x3], 32 }
 0x112   : > { %838 = vsyncadd [#allocation3 + $0x3], 4294967264 }
 0x113   : > { %839 = dma.done.wait [#allocation3 + $0x4], 32 }
 0x114   : > { %840 = vsyncadd [#allocation3 + $0x4], 4294967264 }
 0x115   : > { %841 = dma.done.wait [#allocation3 + $0x5], 32 }
 0x116   : > { %842 = vsyncadd [#allocation3 + $0x5], 4294967264 }
 0x117   : > { %843 = dma.done.wait [#allocation3 + $0x6], 32 }
 0x118   : > { %844 = vsyncadd [#allocation3 + $0x6], 4294967264 }
 0x119   : > { %845 = dma.done.wait [#allocation3 + $0x7], 32 }
 0x11a   : > { %846 = vsyncadd [#allocation3 + $0x7], 4294967264  ;;  %s1221_s6 = scalar_lea.vmem [#allocation7], %s1000_s4  ;;  %v270_v2 = vld [vmem:[#allocation2] sm:$0xff]  ;;  %v271_v5 = vld [vmem:[#allocation2 + $0x8] sm:$0xff]  ;;  %v292_v13 = vlaneseq  ;;  %v294_v18 = vstv %s1008_s7  ;;  %vm298_vm1 = vcmask 7168  }
 0x11b   : > { %v268_v0 = vld [vmem:[%s1221_s6] sm:$0xff]  ;;  %s1222_s10 = smov %s1221_s6  ;;  %v277_v7 = vmul.f32 %v270_v2, %v270_v2  ;;  %v278_v9 = vmul.f32 %v271_v5, %v271_v5  ;;  %s309_s4 = sld [smem:[#allocation4]] }
 0x11c   : > { %v269_v1 = vld [vmem:[%s1222_s10 + $0x8] sm:$0xff]  ;;  %v272_v3 = vmul.f32 %v268_v0, %v268_v0  ;;  %v282_v6 = vmul.f32 %v270_v2, %v268_v0  ;;  %v293_v16 = vshrl.u32 %v292_v13, 7  ;;  %p518_p1 = scmp.eq.s32.totalorder %s932_s0, 1  ;;  %s797_s21 = scalar_lea.hbm %s1209_s3, 16 }
 0x11d   : > { %v273_v4 = vmul.f32 %v269_v1, %v269_v1  ;;  %v283_v8 = vmul.f32 %v271_v5, %v269_v1  ;;  %v279_v12 = vadd.f32 %v278_v9, %v277_v7  ;;  %p798_p11 = scmp.ne.s32.totalorder %s1209_s3, %s797_s21  ;;  %p803_p13 = scmp.lt.u32.totalorder %s797_s21, %s1209_s3 }
 0x11e   : > { %v295_v21 = vadd.s32 %v294_v18, %v293_v16 }
 0x11f   : > { %v274_v10 = vadd.f32 %v273_v4, %v272_v3  ;;  %v284_v11 = vadd.f32 %v283_v8, %v282_v6  ;;  %p799_p10 = pnand %p798_p11, %p518_p1 }
 0x120   : > { %vm296_vm0 = vcmp.lt.s32.totalorder %v295_v21, 16 }
 0x121   : > { %275 = vadd.xlane.f32.xlu0 %v274_v10  ;;  %285 = vadd.xlane.f32.xlu1 %v284_v11  ;;  %p800_p12 = pneg %p799_p10 }
 0x123   : > { %p805_p7 = pnand %p803_p13, %p800_p12 }
 0x125   : > { %280 = vadd.xlane.f32.xlu0 %v279_v12 }
 0x1ae   : > { %v276_v14 = vpop.xlane.xlu0 %275  ;;  %v286_v15 = vpop.xlane.xlu1 %285 }
 0x1af   : > { %v288_v17 = vmul.f32 2.0, %v286_v15 }
 0x1b2   : > { %v281_v19 = vpop.xlane.xlu0 %280 }
 0x1b3   : > { %v287_v20 = vadd.f32 %v281_v19, %v276_v14 }
 0x1b5   : > { %v289_v22 = vsub.f32 %v287_v20, %v288_v17 }
 0x1b7   : > { %v290_v23 = vmax.f32 %v289_v22, 1e-12 }
 0x1b9   : > { %v291_v24 = vmin.f32 %v290_v23, 1e+12 }
 0x1bb   : > { %v297_v25 = vsel %vm296_vm0, %v291_v24, 0.0 }
 0x1bc   : > { %v299_v26 = vsel %vm298_vm1, %v297_v25, 0.0 }
 0x1bd   : > { %300 = vadd.xlane.f32.xlu1 %v299_v26 }
 0x24a   : > { %v301_v27 = vpop.xlane.xlu1 %300 }
 0x24b   : > { %v302_v28 = vrot.slane %v301_v27, 4 }
 0x24d   : > { %v303_v29 = vadd.f32 %v302_v28, %v301_v27 }
 0x24f   : > { %v304_v30 = vrot.slane %v303_v29, 2 }
 0x251   : > { %v305_v31 = vadd.f32 %v304_v30, %v303_v29 }
 0x253   : > { %v306_v32 = vrot.slane %v305_v31, 1 }
 0x255   : > { %v307_v33 = vadd.f32 %v306_v32, %v305_v31 }
 0x257   : > { %502 = vpush %v307_v33 }
 0x288   : > { %s503_s7 = spop %502 }
 0x289   : > { %s310_s16 = sadd.f32 %s503_s7, %s309_s4 }
 0x28b   : > { %312 = sst [smem:[#allocation4]] %s310_s16 }
 0x28c   : > { %s314_s17 = sadd.f32 1.12e-10, %s310_s16 }
 0x28e   : > { %s317_s19 = smul.f32 0.0625, %s314_s17 }
 0x290   : > { %319 = sst [smem:[#allocation10]] %s317_s19 }
 0x291   : > { %808 = shalt.err (!%p805_p7)
}
 0x292   : > { %s880_s8 = smov [#allocation10]  }
 0x293   : > { %509 = dma.smem_to_hbm (%p518_p1), %s880_s8, 16, %s1209_s3, [#allocation9]  }
 0x294   : > { %848 = dma.done.wait (%p518_p1), [#allocation9], 16  }
 0x295   : > { %850 = vsyncadd (%p518_p1), [#allocation9], 4294967280 }
 0x296   : > { %333 = sfence }
 0x297 PF: > { %s1223_s9 = sld [smem:[#allocation30_spill]]  ;;  %s1224_s24 = sld [smem:[#allocation31_spill]] }
 0x298   : > { %p18_p9 = scmp.ge.s32.totalorder %s935_s26, 4   ;;  %s1225_s22 = smov %s857_s23 }
 0x299   : > { %s1227_s25 = smov %s935_s26 }
 0x29a   :  { %20 = sbr.rel (!%p18_p9) target bundleno = 16 (0x10), region = 97 }
 0x29d   : > { %s1226_s23 = smov %s1223_s9 }
 0x2a1   :  { %339 = vsyncpa [#allocation8], 1 }
 0x2a2   :  { %341 = vsyncpa [#allocation8 + $0x1], 1 }
 0x2a3   :  { %342 = vsyncpa [#allocation9], 1 }
 0x2a4   :  { %344 = vsyncpa [#allocation9 + $0x1], 1 }
 0x2a5   :  { %345 = vsyncmov [#allocation3] }
 0x2a8   :  { %s346_s20 = vpop.sfrf %345 }
 0x2a9   :  { %p493_p0 = scmp.ne.s32.totalorder %s346_s20, 0 }
 0x2ab   :  { %350 = shalt.err (%p493_p0)  }
 0x2ac   :  { %352 = vsyncmov [#allocation3 + $0x1] }
 0x2af   :  { %s353_s30 = vpop.sfrf %352 }
 0x2b0   :  { %p494_p2 = scmp.ne.s32.totalorder %s353_s30, 0 }
 0x2b2   :  { %357 = shalt.err (%p494_p2)  }
 0x2b3   :  { %359 = vsyncmov [#allocation3 + $0x2] }
 0x2b6   :  { %s360_s25 = vpop.sfrf %359 }
 0x2b7   :  { %p495_p4 = scmp.ne.s32.totalorder %s360_s25, 0 }
 0x2b9   :  { %364 = shalt.err (%p495_p4)  }
 0x2ba   :  { %366 = vsyncmov [#allocation3 + $0x3] }
 0x2bd   :  { %s367_s28 = vpop.sfrf %366 }
 0x2be   :  { %p496_p5 = scmp.ne.s32.totalorder %s367_s28, 0 }
 0x2c0   :  { %371 = shalt.err (%p496_p5)  }
 0x2c1   :  { %373 = vsyncmov [#allocation3 + $0x4] }
 0x2c4   :  { %s374_s2 = vpop.sfrf %373 }
 0x2c5   :  { %p497_p6 = scmp.ne.s32.totalorder %s374_s2, 0 }
 0x2c7   :  { %378 = shalt.err (%p497_p6)  }
 0x2c8   :  { %380 = vsyncmov [#allocation3 + $0x5] }
 0x2cb   :  { %s381_s3 = vpop.sfrf %380 }
 0x2cc   :  { %p498_p8 = scmp.ne.s32.totalorder %s381_s3, 0 }
 0x2ce   :  { %385 = shalt.err (%p498_p8)  }
 0x2cf   :  { %387 = vsyncmov [#allocation3 + $0x6] }
 0x2d2   :  { %s388_s23 = vpop.sfrf %387 }
 0x2d3   :  { %p499_p3 = scmp.ne.s32.totalorder %s388_s23, 0 }
 0x2d5   :  { %392 = shalt.err (%p499_p3)  }
 0x2d6   :  { %394 = vsyncmov [#allocation3 + $0x7] }
 0x2d9   :  { %s395_s26 = vpop.sfrf %394 }
 0x2da   :  { %p500_p1 = scmp.ne.s32.totalorder %s395_s26, 0 }
 0x2dc   :  { %399 = shalt.err (%p500_p1)  }

</bundles_post_ra>
